<compile_context>
chip_gen: v6e
topology: v6e:2x2x1
jax: 0.10.0
libtpu: 0.0.40
codegen_flags: <defaults>
</compile_context>

<pallas_src>
import jax
import jax.numpy as jnp
from jax.experimental import pallas as pl
from jax.experimental.pallas import tpu as pltpu


def _noise_add_kernel(w_ref, x_ref, noise_ref, o_ref):
    # w_ref:     (1, 1) scalar weight in SMEM
    # x_ref:     (1, C,  T) input block in VMEM
    # noise_ref: (1, Cn, T) noise block in VMEM (Cn == 1 or C)
    # o_ref:     (1, C,  T) output block in VMEM
    w = w_ref[0, 0]
    weighted = (w * noise_ref[...]).astype(x_ref.dtype)
    # jnp broadcasting handles Cn == 1 (channel_same) and Cn == C.
    o_ref[...] = x_ref[...] + weighted


def _pick_spatial_tile(hw: int, c: int, itemsize: int) -> int:
    """Spatial tile T: multiple of 128, x block ~<= 1 MiB, capped at HW."""
    target_bytes = 1 << 20  # ~1 MiB x block -> fits all generations' scoped VMEM
    t = max(128, (target_bytes // max(1, c * itemsize)) // 128 * 128)
    if hw % 128 == 0:
        return min(t, hw)
    # Ragged spatial extent: fall back to a full-axis block (satisfies the
    # "block dim equals full array dim" rule without edge masking concerns).
    return hw


def noise_base_forward(x, noise, weight):
    """x: (N, C, H, W); noise: (N, 1, H, W) or (N, C, H, W); weight: scalar array."""
    N, C, H, W = x.shape
    Cn = noise.shape[1]
    assert noise.shape == (N, Cn, H, W) and Cn in (1, C)

    HW = H * W
    itemsize = jnp.dtype(x.dtype).itemsize

    # Lane-dense layout: flatten spatial dims so the last axis is H*W.
    x2 = x.reshape(N, C, HW)
    n2 = noise.reshape(N, Cn, HW)

    T = _pick_spatial_tile(HW, C, itemsize)
    n_spatial = pl.cdiv(HW, T)

    w_smem = jnp.asarray(weight, jnp.float32).reshape(1, 1)

    grid_spec = pltpu.PrefetchScalarGridSpec(
        num_scalar_prefetch=0,
        grid=(N, n_spatial),
        in_specs=[
            pl.BlockSpec(memory_space=pltpu.MemorySpace.SMEM),          # weight
            pl.BlockSpec((1, C, T), lambda n, s: (n, 0, s)),            # input
            pl.BlockSpec((1, Cn, T), lambda n, s: (n, 0, s)),           # noise
        ],
        out_specs=pl.BlockSpec((1, C, T), lambda n, s: (n, 0, s)),
    )

    x_bytes = x2.size * itemsize
    noise_bytes = n2.size * jnp.dtype(noise.dtype).itemsize
    cost = pl.CostEstimate(
        flops=2 * N * C * HW,              # mul + add per output element
        transcendentals=0,
        bytes_accessed=2 * x_bytes + noise_bytes,   # read x + noise, write out
    )

    out2 = pl.pallas_call(
        _noise_add_kernel,
        out_shape=jax.ShapeDtypeStruct(x2.shape, x.dtype),
        grid_spec=grid_spec,
        compiler_params=pltpu.CompilerParams(
            dimension_semantics=("parallel", "parallel"),
            vmem_limit_bytes=32 * 1024 * 1024,
        ),
        cost_estimate=cost,
        # NOTE: input_output_aliases={1: 0} would save one HBM buffer if the
        # caller donates x; left off so x stays valid for the reference check.
    )(w_smem, x2, n2)

    return out2.reshape(N, C, H, W)


class NoiseBasePallas:
    """Mirror of _NoiseBase.__init__ parameter setup (deterministic)."""

    def __init__(self, strength: float = 0.0, channel_same: bool = True):
        self.init_strength = strength
        self.channel_same = channel_same
        # nn.Parameter(torch.Tensor(1)) initialized with constant(strength)
        self.weight = jnp.full((1,), strength, dtype=jnp.float32)

    def _get_noise_shape(self, x):
        if self.channel_same:
            return (x.shape[0], 1) + tuple(x.shape[2:])
        return tuple(x.shape)

    def __call__(self, x, noise_key):
        noise = jax.random.normal(noise_key, self._get_noise_shape(x),
                                  dtype=jnp.float32)
        return noise_base_forward(x, noise, self.weight), noise


if __name__ == "__main__":
    key = jax.random.PRNGKey(0)
    k_x, k_noise = jax.random.split(key)

    N, C, H, W = 2, 4, 16, 16
    x = jax.random.normal(k_x, (N, C, H, W), dtype=jnp.float32)

    # channel_same=True (broadcast noise over channels)
    module = NoiseBasePallas(strength=0.25, channel_same=True)
    out, noise = module(x, k_noise)
    out = jax.block_until_ready(out)

    ref = x + (module.weight[0] * noise).astype(x.dtype)
    assert out.shape == x.shape and out.dtype == x.dtype
    assert jnp.allclose(out, ref, atol=1e-6, rtol=1e-6)

    # channel_same=False (full-shape noise)
    module2 = NoiseBasePallas(strength=-1.5, channel_same=False)
    out2, noise2 = module2(x, k_noise)
    out2 = jax.block_until_ready(out2)
    ref2 = x + (module2.weight[0] * noise2).astype(x.dtype)
    assert jnp.allclose(out2, ref2, atol=1e-6, rtol=1e-6)

    # Larger, spatially-tiled case (HW > tile) to exercise the 2-D grid path.
    N3, C3, H3, W3 = 2, 8, 128, 256   # HW = 32768 -> multiple spatial tiles
    k3x, k3n = jax.random.split(jax.random.PRNGKey(1))
    x3 = jax.random.normal(k3x, (N3, C3, H3, W3), dtype=jnp.float32)
    module3 = NoiseBasePallas(strength=0.5, channel_same=True)
    out3, noise3 = module3(x3, k3n)
    out3 = jax.block_until_ready(out3)
    ref3 = x3 + (module3.weight[0] * noise3).astype(x3.dtype)
    assert jnp.allclose(out3, ref3, atol=1e-6, rtol=1e-6)

    print("KERNEL_OK")
</pallas_src>

<mosaic_0001>
module attributes {stable_mosaic.version = 11 : i64} {
  func.func @_noise_add_kernel(%arg0: i32, %arg1: i32, %arg2: memref<1x1xf32, #tpu.memory_space<smem>>, %arg3: memref<1x4x256xf32, #tpu.memory_space<vmem>>, %arg4: memref<1x1x256xf32, #tpu.memory_space<vmem>>, %arg5: memref<1x4x256xf32, #tpu.memory_space<vmem>>) attributes {dimension_semantics = [#tpu.dimension_semantics<parallel>, #tpu.dimension_semantics<parallel>], iteration_bounds = array<i64: 2, 1>, scalar_prefetch = 0 : i64, scratch_operands = 0 : i64, tpu.core_type = #tpu.core_type<tc>, window_params = [{transform_indices = @transform_0, window_bounds = array<i64: 1, 1>}, {transform_indices = @transform_1, window_bounds = array<i64: 1, 4, 256>}, {transform_indices = @transform_2, window_bounds = array<i64: 1, 1, 256>}, {transform_indices = @transform_3, window_bounds = array<i64: 1, 4, 256>}]} {
    %c0 = arith.constant 0 : index
    %c0_0 = arith.constant 0 : index
    %0 = memref.load %arg2[%c0, %c0_0] : memref<1x1xf32, #tpu.memory_space<smem>>
    %c0_1 = arith.constant 0 : index
    %c0_2 = arith.constant 0 : index
    %c0_3 = arith.constant 0 : index
    %1 = vector.load %arg4[%c0_1, %c0_2, %c0_3] : memref<1x1x256xf32, #tpu.memory_space<vmem>>, vector<1x1x256xf32>
    %2 = vector.broadcast %0 : f32 to vector<1x1x256xf32>
    %3 = arith.mulf %2, %1 : vector<1x1x256xf32>
    %c0_4 = arith.constant 0 : index
    %c0_5 = arith.constant 0 : index
    %c0_6 = arith.constant 0 : index
    %4 = vector.load %arg3[%c0_4, %c0_5, %c0_6] : memref<1x4x256xf32, #tpu.memory_space<vmem>>, vector<1x4x256xf32>
    %5 = vector.broadcast %3 : vector<1x1x256xf32> to vector<1x4x256xf32>
    %6 = arith.addf %4, %5 : vector<1x4x256xf32>
    %c0_7 = arith.constant 0 : index
    %c0_8 = arith.constant 0 : index
    %c0_9 = arith.constant 0 : index
    %7 = vector.load %arg5[%c0_7, %c0_8, %c0_9] : memref<1x4x256xf32, #tpu.memory_space<vmem>>, vector<1x4x256xf32>
    tpu.vector_store %arg5[%c0_7, %c0_8, %c0_9], %6 {strides = array<i32>} : memref<1x4x256xf32, #tpu.memory_space<vmem>>, vector<1x4x256xf32>,
    return
  }
  func.func @transform_0(%arg0: i32, %arg1: i32) -> (i32, i32) {
    %c0_i32 = arith.constant 0 : i32
    %c0_i32_0 = arith.constant 0 : i32
    %c0_i32_1 = arith.constant 0 : i32
    return %c0_i32, %c0_i32_0 : i32, i32
  }
  func.func @transform_1(%arg0: i32, %arg1: i32) -> (i32, i32, i32) {
    %c0_i32 = arith.constant 0 : i32
    %c0_i32_0 = arith.constant 0 : i32
    return %arg0, %c0_i32, %arg1 : i32, i32, i32
  }
  func.func @transform_2(%arg0: i32, %arg1: i32) -> (i32, i32, i32) {
    %c0_i32 = arith.constant 0 : i32
    %c0_i32_0 = arith.constant 0 : i32
    return %arg0, %c0_i32, %arg1 : i32, i32, i32
  }
  func.func @transform_3(%arg0: i32, %arg1: i32) -> (i32, i32, i32) {
    %c0_i32 = arith.constant 0 : i32
    %c0_i32_0 = arith.constant 0 : i32
    return %arg0, %c0_i32, %arg1 : i32, i32, i32
  }
}

</mosaic_0001>

<bundles_post_ra>
// kernel: tpu_custom_call.1
= control target key start
LH: loop header
LB: loop body
LE: loop exit
PB: predicated region body
PF: predicated region fallthrough
CT: control target
= control target key end

     0   :  { %s817_s0 = inlined_call_operand.<no memory space> [shape: f32[1,1], index: 0, kind: input, shape index: {}]   ;;  %s818_s1 = inlined_call_operand.hbm [shape: f32[2,4,256], index: 1, kind: input, shape index: {}]   ;;  %s819_s2 = inlined_call_operand.hbm [shape: f32[2,1,256], index: 2, kind: input, shape index: {}]   ;;  %s820_s3 = inlined_call_operand.hbm [shape: f32[2,4,256], index: 3, kind: output, shape index: {}]  }
   0x1   :  { %8 = sst [smem:[#allocation2]] %s817_s0 }
   0x2   :  { %9 = vsyncpa [#allocation4], 0 }
   0x3   :  { %11 = vsyncpa [#allocation4 + $0x1], 0 }
   0x4   :  { %12 = vsyncpa [#allocation7], 0 }
   0x5   :  { %14 = vsyncpa [#allocation7 + $0x1], 0 }
   0x6   :  { %15 = vsyncpa [#allocation5], 0 }
   0x7   :  { %17 = vsyncpa [#allocation5 + $0x1], 0  ;;  %s653_s14 = smov 0   ;;  %s655_s15 = smov 0  }
   0x8   :  { %s657_s16 = smov 0   ;;  %s659_s17 = smov 0  }
   0x9   :  { %s661_s18 = smov 0   ;;  %s663_s19 = smov 0  }
   0xa LB: > { %s396_s0 = sadd.s32 4294967295, %s625_s19   ;;  %s397_s20 = sadd.s32 4294967294, %s625_s19   ;;  %s625_s19 = sphi %s663_s19, %s23_s19   ;;  %s621_s18 = sphi %s661_s18, %s832_s18   ;;  %s617_s17 = sphi %s659_s17, %s831_s17   ;;  %s613_s16 = sphi %s657_s16, %s830_s16   ;;  %s609_s15 = sphi %s655_s15, %s829_s15   ;;  %s605_s14 = sphi %s653_s14, %s828_s14  }
   0xb   : > { %s35_s21 = sadd.s32 1, %s621_s18  ;;  %s65_s22 = sadd.s32 1, %s613_s16 }
   0xc   : > { %p37_p0 = scmp.ge.s32.totalorder %s35_s21, 2  ;;  %p72_p1 = scmp.ne.s32.totalorder %s613_s16, %s609_s15 }
   0xd   : > { %p73_p2 = scmp.eq.s32.totalorder %s625_s19, 0  ;;  %p78_p3 = scmp.ne.s32.totalorder %s609_s15, %s605_s14 }
   0xe   : > { %s834_s21 = smov (%p37_p0, %s35_s21), 0  ;;  %p79_p5 = scmp.eq.s32.totalorder %s396_s0, 0 }
   0xf   : > { %p694_p4 = por %p73_p2, %p72_p1  ;;  %s60_s24 = ssub.s32 %s621_s18, %s834_s21 }
  0x10   : > { %p132_p6 = scmp.eq.s32.totalorder %s396_s0, 1  ;;  %p63_p7 = scmp.eq.s32.totalorder %s60_s24, 0 }
  0x11   : > { %p700_p8 = por %p79_p5, %p78_p3  ;;  %p138_p10 = scmp.eq.s32.totalorder %s397_s20, 1 }
  0x12   : > { %p704_p9 = por %p132_p6, %p72_p1  ;;  %p435_p13 = scmp.lt.s32.totalorder %s625_s19, 2 }
  0x13   : > { %s709_s27 = scalar_select %p63_p7, %s613_s16, %s65_s22  }
  0x14   : > { %p711_p11 = por %p138_p10, %p78_p3  ;;  %s718_s29 = sand.u32 1, %s613_s16  }
  0x15   : > { %s400_s30 = sshll.u32 %s718_s29, 3  ;;  %s415_s4 = sshll.u32 %s621_s18, 7 }
  0x16   : > { %s173_s7 = scalar_lea.hbm %s818_s1, %s415_s4  ;;  %s165_s8 = scalar_lea.vmem [#allocation3], %s400_s30 }
  0x17   : > { %s175_s9 = sshll.u32 %s165_s8, 4  ;;  %p727_p0 = pnand %p435_p13, %p694_p4  ;;  %s176_s9 = int_to_ptr.vmem [resolvable:$true] %s175_s9 }
  0x18   : > { %p406_p1 = scmp.ge.s32.totalorder %s625_s19, 1  ;;  %p201_p2 = scmp.lt.s32.totalorder %s625_s19, 3 }
  0x19   : > { %s162_s11 = scalar_lea.sflag [#allocation4], %s718_s29  ;;  %p487_p3 = pneg %p727_p0 }
  0x1a   : > { %s498_s12 = scalar_lea.vmem %s176_s9, 128  ;;  %s627_s13 = smov [#allocation3]  }
  0x1b   : > { %p499_p5 = scmp.ne.s32.totalorder %s176_s9, %s498_s12  ;;  %s503_s0 = sshll.u32 %s627_s13, 4  ;;  %s504_s0 = int_to_ptr.vmem [resolvable:$false] %s503_s0 }
  0x1c   : > { %s505_s20 = scalar_lea.vmem %s504_s0, 256  ;;  %p506_p4 = scmp.lt.s32.totalorder %s176_s9, %s504_s0 }
  0x1d   : > { %p501_p6 = pnand %p499_p5, %p487_p3  ;;  %p507_p10 = scmp.lt.s32.totalorder %s505_s20, %s498_s12 }
  0x1f   : > { %p502_p7 = pneg %p501_p6  ;;  %p508_p13 = por %p507_p10, %p506_p4 }
  0x21   : > { %p509_p12 = pnand %p508_p13, %p502_p7 }
  0x23   : > { %512 = shalt.err (!%p509_p12)
}
  0x24   : > { %427 = dma.hbm_to_vmem [thread:$0]  (!%p727_p0), %s173_s7, 128, %s176_s9, %s162_s11  }
  0x25   : > { %p745_p5 = pnand %p406_p1, %p201_p2  ;;  %s403_s23 = sshll.u32 %s718_s29, 1 }
  0x26   : > { %s416_s24 = sshll.u32 %s621_s18, 5  ;;  %s186_s6 = scalar_lea.vmem [#allocation6], %s403_s23 }
  0x27   : > { %s194_s5 = scalar_lea.hbm %s819_s2, %s416_s24  ;;  %s196_s8 = sshll.u32 %s186_s6, 4  ;;  %s197_s8 = int_to_ptr.vmem [resolvable:$true] %s196_s8 }
  0x28   : > { %s183_s12 = scalar_lea.sflag [#allocation7], %s718_s29  ;;  %s526_s13 = scalar_lea.vmem %s197_s8, 32 }
  0x29   : > { %p527_p12 = scmp.ne.s32.totalorder %s197_s8, %s526_s13  ;;  %s628_s7 = smov [#allocation6]  }
  0x2a   : > { %s531_s9 = sshll.u32 %s628_s7, 4  ;;  %s532_s9 = int_to_ptr.vmem [resolvable:$false] %s531_s9 }
  0x2b   : > { %p529_p6 = pnand %p527_p12, %p487_p3  ;;  %s533_s11 = scalar_lea.vmem %s532_s9, 64 }
  0x2c   : > { %p534_p1 = scmp.lt.s32.totalorder %s197_s8, %s532_s9  ;;  %p535_p2 = scmp.lt.s32.totalorder %s533_s11, %s526_s13 }
  0x2d   : > { %p530_p7 = pneg %p529_p6 }
  0x2e   : > { %p536_p4 = por %p535_p2, %p534_p1 }
  0x30   : > { %p537_p10 = pnand %p536_p4, %p530_p7 }
  0x32   : > { %540 = shalt.err (!%p537_p10)
}
  0x33   : > { %430 = dma.hbm_to_vmem [thread:$0]  (!%p727_p0), %s194_s5, 32, %s197_s8, %s183_s12  }
  0x34   : > { %205 = sbr.rel (%p745_p5) target bundleno = 89 (0x59), region = 32  ;;  %s763_s29 = sand.u32 (!%p745_p5), 1, %s609_s15  }
  0x35   : > { %s407_s0 = sshll.u32 (!%p745_p5), %s763_s29, 3  ;;  %s208_s20 = scalar_lea.sflag (!%p745_p5), [#allocation4], %s763_s29 }
  0x36   : > { %s211_s23 = scalar_lea.vmem (!%p745_p5), [#allocation3], %s407_s0 }
  0x39   : > { %592 = dma.done.wait (%p700_p8), %s208_s20, 128  }
  0x3a   : > { %594 = vsyncadd (%p700_p8), %s208_s20, 4294967168  ;;  %s408_s10 = sshll.u32 %s763_s29, 1  ;;  %s217_s22 = scalar_lea.sflag [#allocation7], %s763_s29 }
  0x3b   : > { %s220_s24 = scalar_lea.vmem [#allocation6], %s408_s10 }
  0x3c   : > { %596 = dma.done.wait (%p700_p8), %s217_s22, 32  }
  0x3d   : > { %598 = vsyncadd (%p700_p8), %s217_s22, 4294967264  ;;  %v257_v0 = vlaneseq  ;;  %s251_s30 = sld [smem:[#allocation2]]  ;;  %v252_v4 = vld [vmem:[%s220_s24] sm:$0x3]  ;;  %v255_v9 = vld [vmem:[%s211_s23] sm:$0xff]  ;;  %s247_s4 = scalar_lea.vmem [#allocation8], %s407_s0 }
  0x3e   : > { %s286_s5 = sshll.u32 %s247_s4, 4  ;;  %s417_s6 = sshll.u32 %s617_s17, 7  ;;  %s287_s5 = int_to_ptr.vmem [resolvable:$true] %s286_s5 }
  0x3f   : > { %v258_v1 = vshrl.u32 %v257_v0, 7  ;;  %s284_s12 = scalar_lea.hbm %s820_s3, %s417_s6  ;;  %s270_s13 = scalar_lea.sflag [#allocation5], %s763_s29 }
  0x40   : > { %s541_s7 = scalar_lea.vmem %s287_s5, 128  ;;  %s629_s9 = smov [#allocation8]  }
  0x41   : > { %v259_v2 = vsub.s32 0, %v258_v1  ;;  %v263_v3 = vsub.s32 1, %v258_v1  ;;  %p542_p8 = scmp.ne.s32.totalorder %s287_s5, %s541_s7  ;;  %s545_s11 = sshll.u32 %s629_s9, 4  ;;  %s546_s11 = int_to_ptr.vmem [resolvable:$false] %s545_s11 }
  0x42   : > { %s547_s0 = scalar_lea.vmem %s546_s11, 256  ;;  %p548_p13 = scmp.lt.s32.totalorder %s287_s5, %s546_s11 }
  0x43   : > { %v253_v5 = vstv %s251_s30  ;;  %p543_p0 = pnand %p542_p8, %p704_p9  ;;  %p549_p5 = scmp.lt.s32.totalorder %s547_s0, %s541_s7 }
  0x44   : > { %v254_v6 = vmul.f32 %v253_v5, %v252_v4 }
  0x45   : > { %p544_p3 = pneg %p543_p0  ;;  %p550_p12 = por %p549_p5, %p548_p13 }
  0x46   : > { %v260_v7 = vrot.slane %v254_v6, %v259_v2  ;;  %v264_v8 = vrot.slane %v254_v6, %v263_v3 }
  0x47   : > { %p551_p6 = pnand %p550_p12, %p544_p3 }
  0x48   : > { %v265_v10 = vcombine.low %v260_v7, %v264_v8 }
  0x4a   : > { %v267_v11 = vadd.f32 %v265_v10, %v255_v9 }
  0x4c   : > { %268 = vst [vmem:[%s247_s4] sm:$0xff] %v267_v11 }
  0x4d   : > { %554 = shalt.err (!%p551_p6)
}
  0x4e   : > { %s555_s17 = scalar_lea.hbm %s284_s12, 128  ;;  %s559_s23 = scalar_lea.hbm %s820_s3, 256 }
  0x4f   : > { %p556_p7 = scmp.ne.s32.totalorder %s284_s12, %s555_s17  ;;  %p560_p4 = scmp.lt.s32.totalorder %s284_s12, %s820_s3 }
  0x50   : > { %p561_p10 = scmp.lt.s32.totalorder %s559_s23, %s555_s17 }
  0x51   : > { %p557_p1 = pnand %p556_p7, %p704_p9 }
  0x52   : > { %p562_p8 = por %p561_p10, %p560_p4 }
  0x53   : > { %p558_p2 = pneg %p557_p1 }
  0x55   : > { %p563_p0 = pnand %p562_p8, %p558_p2 }
  0x57   : > { %566 = shalt.err (!%p563_p0)
}
  0x58   : > { %422 = dma.vmem_to_hbm [thread:$0]  (%p704_p9), %s287_s5, 128, %s284_s12, %s270_s13  }
  0x59 PF: > { %s298_s24 = sand.u32 1, %s605_s14   ;;  %p827_p3 = scmp.ge.s32.totalorder %s625_s19, 2 }
  0x5a   : > { %s299_s30 = scalar_lea.sflag [#allocation5], %s298_s24 }
  0x5b   : > { %p432_p13 = pnand %p827_p3, %p711_p11 }
  0x5d   : > { %p433_p5 = pneg %p432_p13 }
  0x5f   : > { %600 = dma.done.wait (%p433_p5), %s299_s30, 128  }
  0x60   : > { %602 = vsyncadd (%p433_p5), %s299_s30, 4294967168  ;;  %s23_s19 = sadd.s32 1, %s625_s19   ;;  %s828_s14 = smov %s609_s15 }
  0x61   : > { %p20_p12 = scmp.ge.s32.totalorder %s23_s19, 4   ;;  %s829_s15 = smov %s613_s16 }
  0x62   : > { %s830_s16 = smov %s709_s27  ;;  %s831_s17 = smov %s621_s18 }
  0x63   : > { %s832_s18 = smov %s834_s21  ;;  %22 = sbr.rel (!%p20_p12) target bundleno = 10 (0xa), region = 90 }
  0x68   :  { %304 = vsyncpa [#allocation4], 1 }
  0x69   :  { %306 = vsyncpa [#allocation4 + $0x1], 1 }
  0x6a   :  { %307 = vsyncpa [#allocation7], 1 }
  0x6b   :  { %309 = vsyncpa [#allocation7 + $0x1], 1 }
  0x6c   :  { %310 = vsyncpa [#allocation5], 1 }
  0x6d   :  { %312 = vsyncpa [#allocation5 + $0x1], 1 }

</bundles_post_ra>
